<compile_context>
chip_gen: v7x
topology: tpu7x:2x2x1
jax: 0.10.0
libtpu: 0.0.40
codegen_flags: <defaults>
</compile_context>

<pallas_src>
import jax
import jax.numpy as jnp
from jax.experimental import pallas as pl
from jax.experimental.pallas import tpu as pltpu

SMOOTH = 1e-6
LANES = 128
TILE_ROWS = 4096      # 4096 x 128 f32 = 2 MiB per input tile on all generations
NCORES = 2            # v7x TensorCore split


def _tpu_kind() -> str:
    try:
        return jax.devices()[0].device_kind.lower()
    except Exception:
        return ""


def _dice_partials_kernel(n_ref, p_ref, t_ref, out_ref, acc_ref):
    """Accumulate per-lane partial sums of sig(p)*t, sig(p)^2, t^2.

    acc_ref: (8, 128) f32 VMEM scratch, rows 0..2 used, resident per core.
    out_ref block: (1, 8, 128) f32, written once at the last reduction step.
    """
    c = pl.program_id(0)       # core-split index
    k = pl.program_id(1)       # tile index within this core's shard
    nk = pl.num_programs(1)

    @pl.when(k == 0)
    def _():
        acc_ref[...] = jnp.zeros_like(acc_ref)

    block_rows, lanes = p_ref.shape
    tile_elems = block_rows * lanes
    n = n_ref[0]

    # NOTE: int32 index math; fine for n << 2^31 (typical segmentation sizes).
    logical_tile = c * nk + k
    tile_start = logical_tile * tile_elems
    tile_end = tile_start + tile_elems

    def accumulate(p, t):
        acc_ref[0:1, :] += jnp.sum(p * t, axis=0, keepdims=True)
        acc_ref[1:2, :] += jnp.sum(p * p, axis=0, keepdims=True)
        acc_ref[2:3, :] += jnp.sum(t * t, axis=0, keepdims=True)

    # Steady state: tile lies entirely within the valid n elements -> no mask.
    @pl.when(tile_end <= n)
    def _():
        p = jax.nn.sigmoid(p_ref[...].astype(jnp.float32))
        t = t_ref[...].astype(jnp.float32)
        accumulate(p, t)

    # Boundary tile only: mask pad tail / partial-block garbage (elements >= n).
    @pl.when(jnp.logical_and(tile_end > n, tile_start < n))
    def _():
        ridx = jax.lax.broadcasted_iota(jnp.int32, (block_rows, lanes), 0)
        lidx = jax.lax.broadcasted_iota(jnp.int32, (block_rows, lanes), 1)
        mask = (tile_start + ridx * lanes + lidx) < n
        p = jnp.where(mask, jax.nn.sigmoid(p_ref[...].astype(jnp.float32)), 0.0)
        t = jnp.where(mask, t_ref[...].astype(jnp.float32), 0.0)
        accumulate(p, t)

    # Tiles with tile_start >= n (clamped duplicates) contribute nothing.

    @pl.when(k == nk - 1)
    def _():
        out_ref[0] = acc_ref[...]


def binary_dice_loss(y_pred: jax.Array, y_true: jax.Array,
                     smooth: float = SMOOTH) -> jax.Array:
    """Pallas TPU implementation of BinaryDiceLoss.forward (returns scalar)."""
    assert y_pred.shape == y_true.shape
    n = int(y_pred.size)
    if n == 0:
        return jnp.float32(0.0)

    # Flatten (free). Keep original dtypes; the kernel upcasts in-register.
    p_flat = jnp.reshape(y_pred, (-1,))
    t_flat = jnp.reshape(y_true, (-1,))

    # Pad only if n is not a multiple of 128; pad values are masked in the
    # boundary tile, so correctness never depends on the pad contents.
    # TODO(synk): for very large non-128-aligned inputs a manual-DMA ragged
    # tail would avoid this full-array pad copy; aligned shapes pay nothing.
    pad = (-n) % LANES
    if pad:
        p_flat = jnp.pad(p_flat, (0, pad))
        t_flat = jnp.pad(t_flat, (0, pad))
    rows = (n + pad) // LANES
    p2d = p_flat.reshape(rows, LANES)
    t2d = t_flat.reshape(rows, LANES)

    block_rows = rows if rows < TILE_ROWS else TILE_ROWS
    total_tiles = pl.cdiv(rows, block_rows)

    # Split across the two TensorCores only where it helps (v7x) and only when
    # there is more than one tile of work; avoids duplicate DMA on v5e/v6e.
    kind = _tpu_kind()
    ncores = NCORES if ("v7" in kind and total_tiles >= NCORES) else 1
    tiles_per_core = pl.cdiv(total_tiles, ncores)
    leading_sem = pltpu.CORE_PARALLEL if ncores > 1 else pltpu.ARBITRARY

    def in_map(c, k, n_sref):
        # Clamp so the DMA block index is always in range; logically
        # out-of-range tiles are fully skipped inside the kernel.
        return (jnp.minimum(c * tiles_per_core + k, total_tiles - 1), 0)

    bytes_in = n * (p2d.dtype.itemsize + t2d.dtype.itemsize)
    cost = pl.CostEstimate(
        flops=9 * n,
        transcendentals=n,
        bytes_accessed=bytes_in + ncores * 8 * LANES * 4,
    )

    partials = pl.pallas_call(
        _dice_partials_kernel,
        out_shape=jax.ShapeDtypeStruct((ncores, 8, LANES), jnp.float32),
        grid_spec=pltpu.PrefetchScalarGridSpec(
            num_scalar_prefetch=1,
            grid=(ncores, tiles_per_core),
            in_specs=[
                pl.BlockSpec((block_rows, LANES), in_map),
                pl.BlockSpec((block_rows, LANES), in_map),
            ],
            out_specs=pl.BlockSpec((1, 8, LANES),
                                   lambda c, k, n_sref: (c, 0, 0)),
            scratch_shapes=[pltpu.VMEM((8, LANES), jnp.float32)],
        ),
        compiler_params=pltpu.CompilerParams(
            dimension_semantics=(leading_sem, pltpu.ARBITRARY)),
        cost_estimate=cost,
    )(jnp.array([n], dtype=jnp.int32), p2d, t2d)

    sums = jnp.sum(partials, axis=(0, 2))   # (8,); rows 0..2 meaningful
    numerator = 2.0 * sums[0] + smooth
    denominator = sums[1] + sums[2] + smooth
    # torch.mean of a scalar is the scalar itself.
    return 1.0 - numerator / denominator


def _reference(y_pred, y_true, smooth=SMOOTH):
    p = jax.nn.sigmoid(y_pred.astype(jnp.float32))
    t = y_true.astype(jnp.float32)
    num = 2.0 * jnp.sum(p * t) + smooth
    den = jnp.sum(p * p) + jnp.sum(t * t) + smooth
    return 1.0 - num / den


if __name__ == "__main__":
    key = jax.random.PRNGKey(0)
    k1, k2, k3, k4 = jax.random.split(key, 4)

    # Small NCHW shapes consistent with a segmentation logit / binary mask.
    N, C, H, W = 2, 4, 16, 16
    y_pred = jax.random.normal(k1, (N, C, H, W), dtype=jnp.float32)
    y_true = (jax.random.uniform(k2, (N, C, H, W)) > 0.5).astype(jnp.float32)

    loss = jax.block_until_ready(binary_dice_loss(y_pred, y_true))
    ref = jax.block_until_ready(_reference(y_pred, y_true))
    assert jnp.allclose(loss, ref, atol=1e-5, rtol=1e-5), (loss, ref)

    # Non-128-aligned shape exercises the boundary-tile mask path.
    yp2 = jax.random.normal(k3, (2, 3, 17, 5), dtype=jnp.float32)
    yt2 = (jax.random.uniform(k4, (2, 3, 17, 5)) > 0.5).astype(jnp.float32)
    loss2 = jax.block_until_ready(binary_dice_loss(yp2, yt2))
    ref2 = jax.block_until_ready(_reference(yp2, yt2))
    assert jnp.allclose(loss2, ref2, atol=1e-5, rtol=1e-5), (loss2, ref2)

    print("KERNEL_OK")
</pallas_src>

<mosaic_0001>
module attributes {stable_mosaic.version = 11 : i64} {
  func.func @_dice_partials_kernel(%arg0: i32, %arg1: i32, %arg2: memref<1xi32, #tpu.memory_space<smem>>, %arg3: memref<16x128xf32, #tpu.memory_space<vmem>>, %arg4: memref<16x128xf32, #tpu.memory_space<vmem>>, %arg5: memref<1x8x128xf32, #tpu.memory_space<vmem>>, %arg6: memref<8x128xf32, #tpu.memory_space<vmem>>) attributes {dimension_semantics = [#tpu.dimension_semantics<arbitrary>, #tpu.dimension_semantics<arbitrary>], iteration_bounds = array<i64: 1, 1>, scalar_prefetch = 1 : i64, scratch_operands = 1 : i64, tpu.core_type = #tpu.core_type<tc>, window_params = [{transform_indices = @transform_0, window_bounds = array<i64: 16, 128>}, {transform_indices = @transform_1, window_bounds = array<i64: 16, 128>}, {transform_indices = @transform_2, window_bounds = array<i64: 1, 8, 128>}]} {
    %c0_i32 = arith.constant 0 : i32
    %0 = arith.cmpi eq, %arg1, %c0_i32 : i32
    %1 = arith.extui %0 : i1 to i32
    %c0_i32_0 = arith.constant 0 : i32
    %2 = arith.cmpi ne, %1, %c0_i32_0 : i32
    scf.if %2 {
      %cst = arith.constant 0.000000e+00 : f32
      %19 = vector.broadcast %cst : f32 to vector<8x128xf32>
      %c0_6 = arith.constant 0 : index
      %c0_7 = arith.constant 0 : index
      %20 = vector.load %arg6[%c0_6, %c0_7] : memref<8x128xf32, #tpu.memory_space<vmem>>, vector<8x128xf32>
      tpu.vector_store %arg6[%c0_6, %c0_7], %19 {strides = array<i32>} : memref<8x128xf32, #tpu.memory_space<vmem>>, vector<8x128xf32>,
    } else {
    }
    %c0 = arith.constant 0 : index
    %3 = memref.load %arg2[%c0] : memref<1xi32, #tpu.memory_space<smem>>
    %c1_i32 = arith.constant 1 : i32
    %4 = arith.muli %arg0, %c1_i32 : i32
    %5 = arith.addi %4, %arg1 : i32
    %c2048_i32 = arith.constant 2048 : i32
    %6 = arith.muli %5, %c2048_i32 : i32
    %c2048_i32_1 = arith.constant 2048 : i32
    %7 = arith.addi %6, %c2048_i32_1 : i32
    %8 = arith.cmpi sle, %7, %3 : i32
    %9 = arith.extui %8 : i1 to i32
    %c0_i32_2 = arith.constant 0 : i32
    %10 = arith.cmpi ne, %9, %c0_i32_2 : i32
    scf.if %10 {
      %c0_6 = arith.constant 0 : index
      %c0_7 = arith.constant 0 : index
      %19 = vector.load %arg3[%c0_6, %c0_7] : memref<16x128xf32, #tpu.memory_space<vmem>>, vector<16x128xf32>
      %20 = arith.negf %19 : vector<16x128xf32>
      %21 = math.exp %20 : vector<16x128xf32>
      %cst = arith.constant 1.000000e+00 : f32
      %22 = vector.broadcast %cst : f32 to vector<16x128xf32>
      %23 = arith.addf %22, %21 : vector<16x128xf32>
      %24 = arith.divf %22, %23 : vector<16x128xf32>
      %c0_8 = arith.constant 0 : index
      %c0_9 = arith.constant 0 : index
      %25 = vector.load %arg4[%c0_8, %c0_9] : memref<16x128xf32, #tpu.memory_space<vmem>>, vector<16x128xf32>
      %c0_10 = arith.constant 0 : index
      %c0_11 = arith.constant 0 : index
      %26 = vector.load %arg6[%c0_10, %c0_11] : memref<8x128xf32, #tpu.memory_space<vmem>>, vector<1x128xf32>
      %27 = arith.mulf %24, %25 : vector<16x128xf32>
      %cst_12 = arith.constant dense<0.000000e+00> : vector<128xf32>
      %28 = vector.multi_reduction <add>, %27, %cst_12 [0] : vector<16x128xf32> to vector<128xf32>
      %29 = vector.shape_cast %28 : vector<128xf32> to vector<1x128xf32>
      %30 = arith.addf %26, %29 : vector<1x128xf32>
      %c0_13 = arith.constant 0 : index
      %c0_14 = arith.constant 0 : index
      %31 = vector.load %arg6[%c0_13, %c0_14] : memref<8x128xf32, #tpu.memory_space<vmem>>, vector<1x128xf32>
      tpu.vector_store %arg6[%c0_13, %c0_14], %30 {strides = array<i32>} : memref<8x128xf32, #tpu.memory_space<vmem>>, vector<1x128xf32>,
      %c1 = arith.constant 1 : index
      %c0_15 = arith.constant 0 : index
      %32 = vector.load %arg6[%c1, %c0_15] : memref<8x128xf32, #tpu.memory_space<vmem>>, vector<1x128xf32>
      %33 = arith.mulf %24, %24 : vector<16x128xf32>
      %cst_16 = arith.constant dense<0.000000e+00> : vector<128xf32>
      %34 = vector.multi_reduction <add>, %33, %cst_16 [0] : vector<16x128xf32> to vector<128xf32>
      %35 = vector.shape_cast %34 : vector<128xf32> to vector<1x128xf32>
      %36 = arith.addf %32, %35 : vector<1x128xf32>
      %c1_17 = arith.constant 1 : index
      %c0_18 = arith.constant 0 : index
      %37 = vector.load %arg6[%c1_17, %c0_18] : memref<8x128xf32, #tpu.memory_space<vmem>>, vector<1x128xf32>
      tpu.vector_store %arg6[%c1_17, %c0_18], %36 {strides = array<i32>} : memref<8x128xf32, #tpu.memory_space<vmem>>, vector<1x128xf32>,
      %c2 = arith.constant 2 : index
      %c0_19 = arith.constant 0 : index
      %38 = vector.load %arg6[%c2, %c0_19] : memref<8x128xf32, #tpu.memory_space<vmem>>, vector<1x128xf32>
      %39 = arith.mulf %25, %25 : vector<16x128xf32>
      %cst_20 = arith.constant dense<0.000000e+00> : vector<128xf32>
      %40 = vector.multi_reduction <add>, %39, %cst_20 [0] : vector<16x128xf32> to vector<128xf32>
      %41 = vector.shape_cast %40 : vector<128xf32> to vector<1x128xf32>
      %42 = arith.addf %38, %41 : vector<1x128xf32>
      %c2_21 = arith.constant 2 : index
      %c0_22 = arith.constant 0 : index
      %43 = vector.load %arg6[%c2_21, %c0_22] : memref<8x128xf32, #tpu.memory_space<vmem>>, vector<1x128xf32>
      tpu.vector_store %arg6[%c2_21, %c0_22], %42 {strides = array<i32>} : memref<8x128xf32, #tpu.memory_space<vmem>>, vector<1x128xf32>,
    } else {
    }
    %11 = arith.cmpi sgt, %7, %3 : i32
    %12 = arith.cmpi slt, %6, %3 : i32
    %13 = arith.andi %11, %12 : i1
    %14 = arith.extui %13 : i1 to i32
    %c0_i32_3 = arith.constant 0 : i32
    %15 = arith.cmpi ne, %14, %c0_i32_3 : i32
    scf.if %15 {
      %19 = tpu.iota {dimensions = array<i32: 0>} : vector<16x128xi32>
      %20 = tpu.iota {dimensions = array<i32: 1>} : vector<16x128xi32>
      %c128_i32 = arith.constant 128 : i32
      %21 = vector.broadcast %c128_i32 : i32 to vector<16x128xi32>
      %22 = arith.muli %19, %21 : vector<16x128xi32>
      %23 = vector.broadcast %6 : i32 to vector<16x128xi32>
      %24 = arith.addi %23, %22 : vector<16x128xi32>
      %25 = arith.addi %24, %20 : vector<16x128xi32>
      %26 = vector.broadcast %3 : i32 to vector<16x128xi32>
      %27 = arith.cmpi slt, %25, %26 : vector<16x128xi32>
      %c0_6 = arith.constant 0 : index
      %c0_7 = arith.constant 0 : index
      %28 = vector.load %arg3[%c0_6, %c0_7] : memref<16x128xf32, #tpu.memory_space<vmem>>, vector<16x128xf32>
      %29 = arith.negf %28 : vector<16x128xf32>
      %30 = math.exp %29 : vector<16x128xf32>
      %cst = arith.constant 1.000000e+00 : f32
      %31 = vector.broadcast %cst : f32 to vector<16x128xf32>
      %32 = arith.addf %31, %30 : vector<16x128xf32>
      %33 = arith.divf %31, %32 : vector<16x128xf32>
      %cst_8 = arith.constant 0.000000e+00 : f32
      %34 = vector.broadcast %cst_8 : f32 to vector<16x128xf32>
      %35 = arith.select %27, %33, %34 : vector<16x128xi1>, vector<16x128xf32>
      %c0_9 = arith.constant 0 : index
      %c0_10 = arith.constant 0 : index
      %36 = vector.load %arg4[%c0_9, %c0_10] : memref<16x128xf32, #tpu.memory_space<vmem>>, vector<16x128xf32>
      %cst_11 = arith.constant 0.000000e+00 : f32
      %37 = vector.broadcast %cst_11 : f32 to vector<16x128xf32>
      %38 = arith.select %27, %36, %37 : vector<16x128xi1>, vector<16x128xf32>
      %c0_12 = arith.constant 0 : index
      %c0_13 = arith.constant 0 : index
      %39 = vector.load %arg6[%c0_12, %c0_13] : memref<8x128xf32, #tpu.memory_space<vmem>>, vector<1x128xf32>
      %40 = arith.mulf %35, %38 : vector<16x128xf32>
      %cst_14 = arith.constant dense<0.000000e+00> : vector<128xf32>
      %41 = vector.multi_reduction <add>, %40, %cst_14 [0] : vector<16x128xf32> to vector<128xf32>
      %42 = vector.shape_cast %41 : vector<128xf32> to vector<1x128xf32>
      %43 = arith.addf %39, %42 : vector<1x128xf32>
      %c0_15 = arith.constant 0 : index
      %c0_16 = arith.constant 0 : index
      %44 = vector.load %arg6[%c0_15, %c0_16] : memref<8x128xf32, #tpu.memory_space<vmem>>, vector<1x128xf32>
      tpu.vector_store %arg6[%c0_15, %c0_16], %43 {strides = array<i32>} : memref<8x128xf32, #tpu.memory_space<vmem>>, vector<1x128xf32>,
      %c1 = arith.constant 1 : index
      %c0_17 = arith.constant 0 : index
      %45 = vector.load %arg6[%c1, %c0_17] : memref<8x128xf32, #tpu.memory_space<vmem>>, vector<1x128xf32>
      %46 = arith.mulf %35, %35 : vector<16x128xf32>
      %cst_18 = arith.constant dense<0.000000e+00> : vector<128xf32>
      %47 = vector.multi_reduction <add>, %46, %cst_18 [0] : vector<16x128xf32> to vector<128xf32>
      %48 = vector.shape_cast %47 : vector<128xf32> to vector<1x128xf32>
      %49 = arith.addf %45, %48 : vector<1x128xf32>
      %c1_19 = arith.constant 1 : index
      %c0_20 = arith.constant 0 : index
      %50 = vector.load %arg6[%c1_19, %c0_20] : memref<8x128xf32, #tpu.memory_space<vmem>>, vector<1x128xf32>
      tpu.vector_store %arg6[%c1_19, %c0_20], %49 {strides = array<i32>} : memref<8x128xf32, #tpu.memory_space<vmem>>, vector<1x128xf32>,
      %c2 = arith.constant 2 : index
      %c0_21 = arith.constant 0 : index
      %51 = vector.load %arg6[%c2, %c0_21] : memref<8x128xf32, #tpu.memory_space<vmem>>, vector<1x128xf32>
      %52 = arith.mulf %38, %38 : vector<16x128xf32>
      %cst_22 = arith.constant dense<0.000000e+00> : vector<128xf32>
      %53 = vector.multi_reduction <add>, %52, %cst_22 [0] : vector<16x128xf32> to vector<128xf32>
      %54 = vector.shape_cast %53 : vector<128xf32> to vector<1x128xf32>
      %55 = arith.addf %51, %54 : vector<1x128xf32>
      %c2_23 = arith.constant 2 : index
      %c0_24 = arith.constant 0 : index
      %56 = vector.load %arg6[%c2_23, %c0_24] : memref<8x128xf32, #tpu.memory_space<vmem>>, vector<1x128xf32>
      tpu.vector_store %arg6[%c2_23, %c0_24], %55 {strides = array<i32>} : memref<8x128xf32, #tpu.memory_space<vmem>>, vector<1x128xf32>,
    } else {
    }
    %c0_i32_4 = arith.constant 0 : i32
    %16 = arith.cmpi eq, %arg1, %c0_i32_4 : i32
    %17 = arith.extui %16 : i1 to i32
    %c0_i32_5 = arith.constant 0 : i32
    %18 = arith.cmpi ne, %17, %c0_i32_5 : i32
    scf.if %18 {
      %c0_6 = arith.constant 0 : index
      %c0_7 = arith.constant 0 : index
      %19 = vector.load %arg6[%c0_6, %c0_7] : memref<8x128xf32, #tpu.memory_space<vmem>>, vector<8x128xf32>
      %c0_8 = arith.constant 0 : index
      %c0_9 = arith.constant 0 : index
      %c0_10 = arith.constant 0 : index
      %20 = vector.load %arg5[%c0_8, %c0_9, %c0_10] : memref<1x8x128xf32, #tpu.memory_space<vmem>>, vector<1x8x128xf32>
      %21 = vector.shape_cast %20 : vector<1x8x128xf32> to vector<8x128xf32>
      %22 = vector.shape_cast %19 : vector<8x128xf32> to vector<1x8x128xf32>
      tpu.vector_store %arg5[%c0_8, %c0_9, %c0_10], %22 {strides = array<i32>} : memref<1x8x128xf32, #tpu.memory_space<vmem>>, vector<1x8x128xf32>,
    } else {
    }
    return
  }
  func.func @transform_0(%arg0: i32, %arg1: i32, %arg2: memref<1xi32, #tpu.memory_space<smem>>) -> (i32, i32) {
    %c1_i32 = arith.constant 1 : i32
    %0 = arith.muli %arg0, %c1_i32 : i32
    %1 = arith.addi %0, %arg1 : i32
    %c0_i32 = arith.constant 0 : i32
    %2 = arith.minsi %1, %c0_i32 : i32
    %c0_i32_0 = arith.constant 0 : i32
    %c0_i32_1 = arith.constant 0 : i32
    return %2, %c0_i32_0 : i32, i32
  }
  func.func @transform_1(%arg0: i32, %arg1: i32, %arg2: memref<1xi32, #tpu.memory_space<smem>>) -> (i32, i32) {
    %c1_i32 = arith.constant 1 : i32
    %0 = arith.muli %arg0, %c1_i32 : i32
    %1 = arith.addi %0, %arg1 : i32
    %c0_i32 = arith.constant 0 : i32
    %2 = arith.minsi %1, %c0_i32 : i32
    %c0_i32_0 = arith.constant 0 : i32
    %c0_i32_1 = arith.constant 0 : i32
    return %2, %c0_i32_0 : i32, i32
  }
  func.func @transform_2(%arg0: i32, %arg1: i32, %arg2: memref<1xi32, #tpu.memory_space<smem>>) -> (i32, i32, i32) {
    %c0_i32 = arith.constant 0 : i32
    %c0_i32_0 = arith.constant 0 : i32
    %c0_i32_1 = arith.constant 0 : i32
    return %arg0, %c0_i32, %c0_i32_0 : i32, i32, i32
  }
}

</mosaic_0001>

<bundles_post_ra>
// kernel: tpu_custom_call.1
= control target key start
LH: loop header
LB: loop body
LE: loop exit
PB: predicated region body
PF: predicated region fallthrough
CT: control target
= control target key end

     0   :  { %9 = vsyncpa [#allocation6], 0  ;;  %s426_s0 = inlined_call_operand.<no memory space> [shape: s32[1], index: 0, kind: input, shape index: {}]   ;;  %s427_s1 = inlined_call_operand.hbm [shape: f32[16,128], index: 1, kind: input, shape index: {}]   ;;  %s428_s2 = inlined_call_operand.hbm [shape: f32[16,128], index: 2, kind: input, shape index: {}]   ;;  %s429_s3 = inlined_call_operand.hbm [shape: f32[1,8,128], index: 3, kind: output, shape index: {}]  }
   0x1   :  { %10 = vsyncpa [#allocation9], 0 }
   0x2   :  { %11 = vsyncpa [#allocation7], 0  ;;  %s331_s12 = smov [#allocation5]   ;;  %s259_s16 = scalar_lea.hbm %s427_s1, 256 }
   0x3   :  { %s23_s13 = sshll.u32 %s331_s12, 4  ;;  %p260_p0 = scmp.ne.s32.totalorder %s427_s1, %s259_s16  ;;  %s24_s13 = int_to_ptr.vmem [resolvable:$true] %s23_s13 }
   0x4   :  { %p263_p1 = scmp.lt.u32.totalorder %s259_s16, %s427_s1 }
   0x6   :  { %p265_p2 = pnand %p263_p1, %p260_p0 }
   0x8   :  { %268 = shalt.err (!%p265_p2)
}
   0x9   :  { %s269_s21 = scalar_lea.vmem %s24_s13, 256  ;;  %p274_p4 = scmp.lt.s32.totalorder %s24_s13, %s24_s13 }
   0xa   :  { %p270_p3 = scmp.ne.s32.totalorder %s24_s13, %s269_s21  ;;  %p275_p5 = scmp.lt.s32.totalorder %s269_s21, %s269_s21 }
   0xc   :  { %p276_p6 = por %p275_p5, %p274_p4 }
   0xe   :  { %p277_p7 = pnand %p276_p6, %p270_p3 }
  0x10   :  { %280 = shalt.err (!%p277_p7)
}
  0x11   :  { %s332_s22 = smov 128   ;;  %s333_s23 = smov 8  }
  0x12   :  { %29 = dma.hbm_to_vmem [thread:$0]  %s427_s1, 256, %s24_s13, [#allocation6], %s332_s22, %s332_s22, %s333_s23  }
  0x13   :  { %s334_s26 = smov [#allocation8]   ;;  %s281_s30 = scalar_lea.hbm %s428_s2, 256 }
  0x14   :  { %s41_s27 = sshll.u32 %s334_s26, 4  ;;  %p282_p8 = scmp.ne.s32.totalorder %s428_s2, %s281_s30  ;;  %s42_s27 = int_to_ptr.vmem [resolvable:$true] %s41_s27 }
  0x15   :  { %p285_p9 = scmp.lt.u32.totalorder %s281_s30, %s428_s2 }
  0x17   :  { %p287_p10 = pnand %p285_p9, %p282_p8 }
  0x19   :  { %290 = shalt.err (!%p287_p10)
}
  0x1a   :  { %s291_s8 = scalar_lea.vmem %s42_s27, 256  ;;  %p296_p12 = scmp.lt.s32.totalorder %s42_s27, %s42_s27 }
  0x1b   :  { %p292_p11 = scmp.ne.s32.totalorder %s42_s27, %s291_s8  ;;  %p297_p13 = scmp.lt.s32.totalorder %s291_s8, %s291_s8 }
  0x1d   :  { %p298_p0 = por %p297_p13, %p296_p12 }
  0x1f   :  { %p299_p1 = pnand %p298_p0, %p292_p11 }
  0x21   :  { %302 = shalt.err (!%p299_p1)
}
  0x22   :  { %47 = dma.hbm_to_vmem [thread:$0]  %s428_s2, 256, %s42_s27, [#allocation9], %s332_s22, %s332_s22, %s333_s23  }
  0x23   :  { %325 = dma.done.wait [#allocation6], 256  }
  0x24   :  { %326 = vsyncadd [#allocation6], 4294967040 }
  0x25   :  { %327 = dma.done.wait [#allocation9], 256  }
  0x26   :  { %328 = vsyncadd [#allocation9], 4294967040  ;;  %v335_v0 = vmov 0.0   ;;  %p230_p2 = scmp.lt.s32.totalorder %s426_s0, 2048 }
  0x27   :  { %66 = vst [vmem:[#allocation2] sm:$0xff] %v335_v0  ;;  %v75_v1 = vld [vmem:[#allocation5] sm:$0xff] (!%p230_p2)  ;;  %v76_v2 = vld [vmem:[#allocation5 + $0x8] sm:$0xff] (!%p230_p2)  ;;  %v89_v3 = vld [vmem:[#allocation8] sm:$0xff] (!%p230_p2) }
  0x28   :  { %74 = sbr.rel (%p230_p2) target bundleno = 86 (0x56), region = 25  ;;  %v231_v4 = vmul.f32 (!%p230_p2), -1.442695, %v75_v1  ;;  %v232_v5 = vmul.f32 (!%p230_p2), -1.442695, %v76_v2  ;;  %v90_v6 = vld [vmem:[#allocation8 + $0x8] sm:$0xff] (!%p230_p2)  ;;  %v116_v7 = vmul.f32 (!%p230_p2), %v89_v3, %v89_v3 }
  0x29   :  { %v117_v8 = vmul.f32 (!%p230_p2), %v90_v6, %v90_v6 }
  0x2a   :  { %243 = vpow2.f32 (!%p230_p2), %v231_v4 }
  0x2b   :  { %245 = vpow2.f32 (!%p230_p2), %v232_v5  ;;  %v118_v9 = vadd.f32 (!%p230_p2), %v117_v8, %v116_v7 }
  0x2d   :  { %v119_v10 = vrot.slane (!%p230_p2), %v118_v9, 4 }
  0x2e   :  { %v115_v19 = vld [vmem:[#allocation2 + $0x2] sm:$0x1] (!%p230_p2)  ;;  %v91_v40 = vld [vmem:[#allocation2] sm:$0x1] (!%p230_p2)  ;;  %v103_v41 = vld [vmem:[#allocation2 + $0x1] sm:$0x1] (!%p230_p2) }
  0x2f   :  { %v120_v11 = vadd.f32 %v119_v10, %v118_v9 }
  0x31   :  { %v121_v12 = vrot.slane %v120_v11, 2 }
  0x33   :  { %v122_v13 = vadd.f32 %v121_v12, %v120_v11 }
  0x34   :  { %v244_v14 = vpop.eup %243 }
  0x35   :  { %v246_v15 = vpop.eup %245  ;;  %v83_v16 = vadd.f32 1.0, %v244_v14  ;;  %v123_v17 = vrot.slane %v122_v13, 1 }
  0x36   :  { %v84_v18 = vadd.f32 1.0, %v246_v15 }
  0x37   :  { %247 = vrcp.f32 %v83_v16  ;;  %v124_v20 = vadd.f32 %v123_v17, %v122_v13 }
  0x38   :  { %249 = vrcp.f32 %v84_v18 }
  0x39   :  { %v125_v21 = vadd.f32 %v124_v20, %v115_v19 }
  0x3b   :  { %126 = vst [vmem:[#allocation2 + $0x2] sm:$0x1] %v125_v21 }
  0x41   :  { %v248_v22 = vpop.eup %247 }
  0x42   :  { %v250_v23 = vpop.eup %249  ;;  %v92_v24 = vmul.f32 %v248_v22, %v89_v3  ;;  %v104_v25 = vmul.f32 %v248_v22, %v248_v22 }
  0x43   :  { %v93_v26 = vmul.f32 %v250_v23, %v90_v6  ;;  %v105_v27 = vmul.f32 %v250_v23, %v250_v23 }
  0x45   :  { %v94_v28 = vadd.f32 %v93_v26, %v92_v24  ;;  %v106_v29 = vadd.f32 %v105_v27, %v104_v25 }
  0x47   :  { %v95_v30 = vrot.slane %v94_v28, 4  ;;  %v107_v31 = vrot.slane %v106_v29, 4 }
  0x49   :  { %v96_v32 = vadd.f32 %v95_v30, %v94_v28  ;;  %v108_v33 = vadd.f32 %v107_v31, %v106_v29 }
  0x4b   :  { %v97_v34 = vrot.slane %v96_v32, 2  ;;  %v109_v35 = vrot.slane %v108_v33, 2 }
  0x4d   :  { %v98_v36 = vadd.f32 %v97_v34, %v96_v32  ;;  %v110_v37 = vadd.f32 %v109_v35, %v108_v33 }
  0x4f   :  { %v99_v38 = vrot.slane %v98_v36, 1  ;;  %v111_v39 = vrot.slane %v110_v37, 1 }
  0x51   :  { %v100_v42 = vadd.f32 %v99_v38, %v98_v36  ;;  %v112_v43 = vadd.f32 %v111_v39, %v110_v37 }
  0x53   :  { %v101_v44 = vadd.f32 %v100_v42, %v91_v40  ;;  %v113_v45 = vadd.f32 %v112_v43, %v103_v41 }
  0x55   :  { %102 = vst [vmem:[#allocation2] sm:$0x1] %v101_v44  ;;  %114 = vst [vmem:[#allocation2 + $0x1] sm:$0x1] %v113_v45 }
  0x56 PF:  { %p234_p3 = scmp.gt.s32.totalorder %s426_s0, 0 }
  0x58   :  { %p129_p4 = pnand %p234_p3, %p230_p2 }
  0x59   :  { %v133_v46 = vlaneseq (!%p129_p4)  ;;  %v148_v47 = vld [vmem:[#allocation5] sm:$0xff] (!%p129_p4)  ;;  %v149_v48 = vld [vmem:[#allocation5 + $0x8] sm:$0xff] (!%p129_p4)  ;;  %v145_v55 = vstv (!%p129_p4), %s426_s0  ;;  %v164_v58 = vld [vmem:[#allocation8] sm:$0xff] (!%p129_p4) }
  0x5a   :  { %132 = sbr.rel (%p129_p4) target bundleno = 137 (0x89), region = 29  ;;  %v235_v49 = vmul.f32 (!%p129_p4), -1.442695, %v148_v47  ;;  %v236_v50 = vmul.f32 (!%p129_p4), -1.442695, %v149_v48  ;;  %v165_v61 = vld [vmem:[#allocation8 + $0x8] sm:$0xff] (!%p129_p4) }
  0x5b   :  { %v134_v51 = vshrl.u32 (!%p129_p4), %v133_v46, 7  ;;  %v137_v52 = vand.u32 (!%p129_p4), 127, %v133_v46  ;;  %v192_v13 = vld [vmem:[#allocation2 + $0x2] sm:$0x1] (!%p129_p4) }
  0x5c   :  { %251 = vpow2.f32 (!%p129_p4), %v235_v49  ;;  %v168_v36 = vld [vmem:[#allocation2] sm:$0x1] (!%p129_p4)  ;;  %v180_v37 = vld [vmem:[#allocation2 + $0x1] sm:$0x1] (!%p129_p4) }
  0x5d   :  { %v135_v53 = vadd.s32 (!%p129_p4), 8, %v134_v51  ;;  %v138_v54 = vmul.u32 (!%p129_p4), 128, %v134_v51  ;;  %253 = vpow2.f32 (!%p129_p4), %v236_v50 }
  0x5f   :  { %v139_v56 = vmul.u32 (!%p129_p4), 128, %v135_v53  ;;  %v143_v57 = vadd.s32 (!%p129_p4), %v138_v54, %v137_v52 }
  0x61   :  { %v144_v59 = vadd.s32 %v139_v56, %v137_v52  ;;  %vm398_vm0 = vcmp.lt.s32.totalorder %v143_v57, %v145_v55 }
  0x62   :  { %v166_v62 = vsel %vm398_vm0, %v164_v58, 0.0 }
  0x63   :  { %vm404_vm1 = vcmp.lt.s32.totalorder %v144_v59, %v145_v55  ;;  %v193_v0 = vmul.f32 %v166_v62, %v166_v62 }
  0x64   :  { %v167_v1 = vsel %vm404_vm1, %v165_v61, 0.0 }
  0x65   :  { %v194_v2 = vmul.f32 %v167_v1, %v167_v1 }
  0x66   :  { %v252_v3 = vpop.eup %251 }
  0x67   :  { %v254_v4 = vpop.eup %253  ;;  %v156_v5 = vadd.f32 1.0, %v252_v3  ;;  %v195_v6 = vadd.f32 %v194_v2, %v193_v0 }
  0x68   :  { %v157_v7 = vadd.f32 1.0, %v254_v4 }
  0x69   :  { %255 = vrcp.f32 %v156_v5  ;;  %v196_v8 = vrot.slane %v195_v6, 4 }
  0x6a   :  { %257 = vrcp.f32 %v157_v7 }
  0x6b   :  { %v197_v9 = vadd.f32 %v196_v8, %v195_v6 }
  0x6d   :  { %v198_v10 = vrot.slane %v197_v9, 2 }
  0x6f   :  { %v199_v11 = vadd.f32 %v198_v10, %v197_v9 }
  0x71   :  { %v200_v12 = vrot.slane %v199_v11, 1 }
  0x73   :  { %v256_v14 = vpop.eup %255  ;;  %v201_v15 = vadd.f32 %v200_v12, %v199_v11 }
  0x74   :  { %v258_v16 = vpop.eup %257  ;;  %v162_v17 = vsel %vm398_vm0, %v256_v14, 0.0 }
  0x75   :  { %v163_v18 = vsel %vm404_vm1, %v258_v16, 0.0  ;;  %v169_v19 = vmul.f32 %v166_v62, %v162_v17  ;;  %v181_v20 = vmul.f32 %v162_v17, %v162_v17  ;;  %v202_v21 = vadd.f32 %v201_v15, %v192_v13 }
  0x76   :  { %v170_v22 = vmul.f32 %v167_v1, %v163_v18  ;;  %v182_v23 = vmul.f32 %v163_v18, %v163_v18 }
  0x77   :  { %203 = vst [vmem:[#allocation2 + $0x2] sm:$0x1] %v202_v21 }
  0x78   :  { %v171_v24 = vadd.f32 %v170_v22, %v169_v19  ;;  %v183_v25 = vadd.f32 %v182_v23, %v181_v20 }
  0x7a   :  { %v172_v26 = vrot.slane %v171_v24, 4  ;;  %v184_v27 = vrot.slane %v183_v25, 4 }
  0x7c   :  { %v173_v28 = vadd.f32 %v172_v26, %v171_v24  ;;  %v185_v29 = vadd.f32 %v184_v27, %v183_v25 }
  0x7e   :  { %v174_v30 = vrot.slane %v173_v28, 2  ;;  %v186_v31 = vrot.slane %v185_v29, 2 }
  0x80   :  { %v175_v32 = vadd.f32 %v174_v30, %v173_v28  ;;  %v187_v33 = vadd.f32 %v186_v31, %v185_v29 }
  0x82   :  { %v176_v34 = vrot.slane %v175_v32, 1  ;;  %v188_v35 = vrot.slane %v187_v33, 1 }
  0x84   :  { %v177_v38 = vadd.f32 %v176_v34, %v175_v32  ;;  %v189_v39 = vadd.f32 %v188_v35, %v187_v33 }
  0x86   :  { %v178_v40 = vadd.f32 %v177_v38, %v168_v36  ;;  %v190_v41 = vadd.f32 %v189_v39, %v180_v37 }
  0x88   :  { %179 = vst [vmem:[#allocation2] sm:$0x1] %v178_v40  ;;  %191 = vst [vmem:[#allocation2 + $0x1] sm:$0x1] %v190_v41 }
  0x89 PF:  { %s336_s0 = smov [#allocation10]  }
  0x8a   :  { %s215_s19 = sshll.u32 %s336_s0, 4  ;;  %s216_s19 = int_to_ptr.vmem [resolvable:$true] %s215_s19 }
  0x8b   :  { %s303_s20 = scalar_lea.vmem %s216_s19, 128  ;;  %p308_p6 = scmp.lt.s32.totalorder %s216_s19, %s216_s19 }
  0x8c   :  { %p304_p5 = scmp.ne.s32.totalorder %s216_s19, %s303_s20  ;;  %p309_p7 = scmp.lt.s32.totalorder %s303_s20, %s303_s20 }
  0x8e   :  { %p310_p8 = por %p309_p7, %p308_p6 }
  0x8f   :  { %v207_v42 = vld [vmem:[#allocation2] sm:$0xff] }
  0x90   :  { %208 = vst [vmem:[#allocation10] sm:$0xff] %v207_v42  ;;  %p311_p9 = pnand %p310_p8, %p304_p5 }
  0x92   :  { %314 = shalt.err (!%p311_p9)
}
  0x93   :  { %s315_s23 = scalar_lea.hbm %s429_s3, 128 }
  0x94   :  { %p316_p10 = scmp.ne.s32.totalorder %s429_s3, %s315_s23  ;;  %p319_p11 = scmp.lt.u32.totalorder %s315_s23, %s429_s3 }
  0x96   :  { %p321_p12 = pnand %p319_p11, %p316_p10 }
  0x98   :  { %324 = shalt.err (!%p321_p12)
}
  0x99   :  { %218 = dma.vmem_to_hbm [thread:$0]  %s216_s19, 128, %s429_s3, [#allocation7]  }
  0x9a   :  { %329 = dma.done.wait [#allocation7], 128  }
  0x9b   :  { %330 = vsyncadd [#allocation7], 4294967168 }
  0x9c   :  { %222 = vsyncpa [#allocation6], 1 }
  0x9d   :  { %223 = vsyncpa [#allocation9], 1 }
  0x9e   :  { %224 = vsyncpa [#allocation7], 1 }

</bundles_post_ra>
